<compile_context>
chip_gen: v5e
topology: v5e:2x2
jax: 0.10.0
libtpu: 0.0.40
codegen_flags: <defaults>
</compile_context>

<pallas_src>
import jax
import jax.numpy as jnp
from jax.experimental import pallas as pl
from jax.experimental.pallas import tpu as pltpu


def _make_kernel(heads, layers, mem_dim, block_b, n_nodes,
                 compute_dtype, slab_dtype):
    D = mem_dim
    L = layers
    Hd = D // L
    d_max = D + Hd * (L - 1)        # slab width: [x+Ax | g_0+Ag_0 | ... | g_{L-2}+Ag_{L-2}]
    N = n_nodes
    rows = block_b * N
    tail = d_max - D

    def kernel(adj_ref, x_ref, w_ref, bw_ref, wf_ref, bf_ref, out_ref,
               slab_ref, gbuf_ref, acc_ref):
        h = pl.program_id(1)

        @pl.when(h == 0)
        def _init():
            acc_ref[...] = jnp.zeros_like(acc_ref)
            # Slab tail only needs zeroing to guard against uninitialized-VMEM
            # NaN bit patterns; stale finite values from a previous head are
            # multiplied by exactly-zero padded W rows (contribute 0).
            if tail > 0:
                slab_ref[:, D:] = jnp.zeros((rows, tail), slab_ref.dtype)

        adj_raw = adj_ref[...]                              # (Bt, N, N)
        adj_f32 = adj_raw.astype(jnp.float32)
        adj_c = adj_raw.astype(compute_dtype)
        x = x_ref[...].astype(jnp.float32)                  # (Bt, N, D)
        x2d = x.reshape(rows, D)

        # denom = adj.sum(2) + 1 ; reciprocal + lane broadcast hoisted out of
        # the layer loop (exact reciprocal so the f32 path matches the ref).
        denom = jnp.sum(adj_f32, axis=2, keepdims=True) + 1.0   # (Bt, N, 1)
        inv2d = pl.reciprocal(denom, approx=False).reshape(rows, 1)
        inv_b = jnp.broadcast_to(inv2d, (rows, Hd))             # (rows, Hd)

        # Columns [0:D) of the running-sum slab = x + adj@x.
        ax0 = jnp.einsum('bnm,bmd->bnd', adj_c, x.astype(compute_dtype),
                         preferred_element_type=jnp.float32)     # (Bt, N, D)
        slab_ref[:, :D] = (x2d + ax0.reshape(rows, D)).astype(slab_ref.dtype)

        for l in range(L):
            idx = h * L + l
            W = w_ref[idx].astype(compute_dtype)            # (d_max, Hd), zero-padded rows
            # Same Linear applied to Ax AND outputs in PyTorch -> bias twice.
            b2 = 2.0 * bw_ref[idx].astype(jnp.float32)      # (1, Hd)
            acts = slab_ref[...].astype(compute_dtype)      # (rows, d_max)
            z = jnp.dot(acts, W, preferred_element_type=jnp.float32) + b2
            g2d = jnp.maximum(z * inv_b, 0.0)               # (rows, Hd) f32
            # TODO(synk): gcn_drop (nn.Dropout) treated as identity (eval mode).
            gbuf_ref[:, Hd * l:Hd * (l + 1)] = g2d
            if l < L - 1:
                g3 = g2d.reshape(block_b, N, Hd).astype(compute_dtype)
                ag = jnp.einsum('bnm,bmd->bnd', adj_c, g3,
                                preferred_element_type=jnp.float32)
                col = D + Hd * l
                slab_ref[:, col:col + Hd] = (
                    g2d + ag.reshape(rows, Hd)).astype(slab_ref.dtype)

        # head output = concat of per-layer gAxW + residual; fold the final
        # Linear per head: out = sum_h head_out_h @ W_final[h*D:(h+1)*D, :].
        head_out = gbuf_ref[...] + x2d                      # (rows, D) f32
        wf = wf_ref[h].astype(compute_dtype)                # (D, D), VMEM-resident
        acc_ref[...] += jnp.dot(head_out.astype(compute_dtype), wf,
                                preferred_element_type=jnp.float32)

        @pl.when(h == pl.num_programs(1) - 1)
        def _final():
            out = acc_ref[...] + bf_ref[...].astype(jnp.float32)   # (rows, D)
            out_ref[...] = out.reshape(block_b, N, D).astype(out_ref.dtype)

    return kernel


def multi_graph_conv_layer(adj, x, w_stack, bw_stack, w_final, b_final, *,
                           heads, layers, block_b=1,
                           compute_dtype=jnp.float32, slab_dtype=None,
                           cast_adj=False, vmem_limit_bytes=None):
    """adj: (B, H, N, N), x: (B, N, D) -> (B, N, D).

    w_stack must be zero-padded along the input dim beyond each layer's true
    input width D + Hd*l (as constructed below / by the PyTorch module export).
    """
    B, H, N, N2 = adj.shape
    _, _, D = x.shape
    assert H == heads and N == N2
    assert D % layers == 0, "mem_dim must be divisible by layers"
    assert B % block_b == 0, "block_b must divide the batch"
    L = layers
    Hd = D // L
    d_max = D + Hd * (L - 1)
    assert w_stack.shape == (heads * L, d_max, Hd)
    assert bw_stack.shape == (heads * L, Hd)
    assert w_final.shape == (heads * D, D)
    assert b_final.shape == (1, D)

    slab_dt = compute_dtype if slab_dtype is None else slab_dtype
    rows = block_b * N

    bw3 = bw_stack.reshape(heads * L, 1, Hd)        # leading-axis dynamic index
    wf3 = w_final.reshape(heads, D, D)              # per-head slice of final Linear
    if compute_dtype != jnp.float32:
        w_in = w_stack.astype(compute_dtype)        # halves resident weight VMEM
        wf3 = wf3.astype(compute_dtype)
        adj_in = adj.astype(compute_dtype) if cast_adj else adj
    else:
        w_in = w_stack
        adj_in = adj

    kernel = _make_kernel(heads, L, D, block_b, N, compute_dtype, slab_dt)

    flops = int(B * heads * (2 * N * N * D + (L - 1) * 2 * N * N * Hd
                             + L * 2 * N * d_max * Hd + 2 * N * D * D))
    itemsize = lambda a: a.size * jnp.dtype(a.dtype).itemsize
    # Weights and x are VMEM-resident / per-batch-block -> counted once.
    bytes_accessed = int(itemsize(adj_in) + itemsize(x) + itemsize(w_in)
                         + itemsize(bw3) + itemsize(wf3) + itemsize(b_final)
                         + B * N * D * jnp.dtype(x.dtype).itemsize)

    cp_kwargs = dict(dimension_semantics=("parallel", "arbitrary"))
    if vmem_limit_bytes is not None:
        cp_kwargs["vmem_limit_bytes"] = int(vmem_limit_bytes)

    out = pl.pallas_call(
        kernel,
        out_shape=jax.ShapeDtypeStruct((B, N, D), x.dtype),
        grid_spec=pltpu.PrefetchScalarGridSpec(
            num_scalar_prefetch=0,
            grid=(B // block_b, heads),
            in_specs=[
                # per-(batch-block, head) adjacency tile
                pl.BlockSpec((block_b, None, N, N), lambda b, h: (b, h, 0, 0)),
                # x: same block across heads -> fetched once per batch block
                pl.BlockSpec((block_b, N, D), lambda b, h: (b, 0, 0)),
                # weights: full stacks, constant index_map -> fetched once,
                # VMEM-resident for the whole grid; head selected in-kernel.
                pl.BlockSpec((heads * L, d_max, Hd), lambda b, h: (0, 0, 0)),
                pl.BlockSpec((heads * L, 1, Hd), lambda b, h: (0, 0, 0)),
                pl.BlockSpec((heads, D, D), lambda b, h: (0, 0, 0)),
                pl.BlockSpec((1, D), lambda b, h: (0, 0)),
            ],
            out_specs=pl.BlockSpec((block_b, N, D), lambda b, h: (b, 0, 0)),
            scratch_shapes=[
                pltpu.VMEM((rows, d_max), slab_dt),     # running-sum slab
                pltpu.VMEM((rows, D), jnp.float32),     # per-layer g buffer
                pltpu.VMEM((rows, D), jnp.float32),     # output accumulator
            ],
        ),
        compiler_params=pltpu.CompilerParams(**cp_kwargs),
        cost_estimate=pl.CostEstimate(
            flops=flops, transcendentals=0, bytes_accessed=bytes_accessed),
    )(adj_in, x, w_in, bw3, wf3, b_final)
    return out


def reference_forward(adj, x, w_stack, bw_stack, w_final, b_final,
                      *, heads, layers):
    """Pure-JAX reference mirroring the PyTorch forward (eval mode)."""
    B, H, N, _ = adj.shape
    D = x.shape[-1]
    head_dim = D // layers
    multi_head = []
    for i in range(heads):
        A = adj[:, i]                                   # (B, N, N)
        denom = A.sum(2)[..., None] + 1.0               # (B, N, 1)
        outputs = x
        cache = [x]
        out_list = []
        for l in range(layers):
            idx = i * layers + l
            cur_in = D + head_dim * l
            W = w_stack[idx, :cur_in, :]
            b = bw_stack[idx]
            Ax = jnp.einsum('bnm,bmd->bnd', A, outputs)
            AxW = Ax @ W + b
            AxW = AxW + (outputs @ W + b)
            AxW = AxW / denom
            g = jax.nn.relu(AxW)
            cache.append(g)
            outputs = jnp.concatenate(cache, axis=2)
            out_list.append(g)
        head_out = jnp.concatenate(out_list, axis=2) + x
        multi_head.append(head_out)
    final = jnp.concatenate(multi_head, axis=2)
    return final @ w_final + b_final[0]


if __name__ == "__main__":
    # Small deterministic shapes consistent with the module.
    B, N = 2, 8
    mem_dim = 32
    layers = 2
    heads = 3
    head_dim = mem_dim // layers                  # 16
    d_max = mem_dim + head_dim * (layers - 1)     # 48

    key = jax.random.PRNGKey(0)
    k_adj, k_x, k_w, k_bw, k_wf, k_bf = jax.random.split(key, 6)

    adj = jax.random.uniform(k_adj, (B, heads, N, N), dtype=jnp.float32)
    x = jax.random.normal(k_x, (B, N, mem_dim), dtype=jnp.float32)

    w_stack = jnp.zeros((heads * layers, d_max, head_dim), dtype=jnp.float32)
    bw_stack = 0.02 * jax.random.normal(
        k_bw, (heads * layers, head_dim), dtype=jnp.float32)
    w_keys = jax.random.split(k_w, heads * layers)
    for i in range(heads):
        for j in range(layers):
            idx = i * layers + j
            cur_in = mem_dim + head_dim * j
            w = 0.1 * jax.random.normal(
                w_keys[idx], (cur_in, head_dim), dtype=jnp.float32)
            w_stack = w_stack.at[idx, :cur_in, :].set(w)

    w_final = 0.1 * jax.random.normal(
        k_wf, (heads * mem_dim, mem_dim), dtype=jnp.float32)
    b_final = 0.02 * jax.random.normal(k_bf, (1, mem_dim), dtype=jnp.float32)

    ref = reference_forward(adj, x, w_stack, bw_stack, w_final, b_final,
                            heads=heads, layers=layers)

    # f32 path, one batch element per grid step (2 parallel batch steps ->
    # shards across the 2 TensorCores on v7x).
    out1 = jax.block_until_ready(multi_graph_conv_layer(
        adj, x, w_stack, bw_stack, w_final, b_final,
        heads=heads, layers=layers, block_b=1))
    assert out1.shape == (B, N, mem_dim)
    assert jnp.allclose(out1, ref, atol=1e-4, rtol=1e-4), "block_b=1 mismatch"

    # f32 path, whole batch per grid step (bigger MXU M dimension).
    out2 = jax.block_until_ready(multi_graph_conv_layer(
        adj, x, w_stack, bw_stack, w_final, b_final,
        heads=heads, layers=layers, block_b=2))
    assert jnp.allclose(out2, ref, atol=1e-4, rtol=1e-4), "block_b=2 mismatch"

    # bf16 MXU path (default production path on v6e/v7x). adj stays f32 so the
    # normalizer is exact; only the matmul operands are bf16.
    out_bf = jax.block_until_ready(multi_graph_conv_layer(
        adj, x, w_stack, bw_stack, w_final, b_final,
        heads=heads, layers=layers, block_b=2, compute_dtype=jnp.bfloat16))
    assert jnp.allclose(out_bf, ref, atol=0.15, rtol=0.1), "bf16 path mismatch"

    print("KERNEL_OK")
</pallas_src>

<mosaic_0001>
module attributes {stable_mosaic.version = 11 : i64} {
  func.func @kernel(%arg0: i32, %arg1: i32, %arg2: memref<1x1x8x8xf32, #tpu.memory_space<vmem>>, %arg3: memref<1x8x32xf32, #tpu.memory_space<vmem>>, %arg4: memref<6x48x16xf32, #tpu.memory_space<vmem>>, %arg5: memref<6x1x16xf32, #tpu.memory_space<vmem>>, %arg6: memref<3x32x32xf32, #tpu.memory_space<vmem>>, %arg7: memref<1x32xf32, #tpu.memory_space<vmem>>, %arg8: memref<1x8x32xf32, #tpu.memory_space<vmem>>, %arg9: memref<8x48xf32, #tpu.memory_space<vmem>>, %arg10: memref<8x32xf32, #tpu.memory_space<vmem>>, %arg11: memref<8x32xf32, #tpu.memory_space<vmem>>) attributes {dimension_semantics = [#tpu.dimension_semantics<parallel>, #tpu.dimension_semantics<arbitrary>], iteration_bounds = array<i64: 2, 3>, scalar_prefetch = 0 : i64, scratch_operands = 3 : i64, tpu.core_type = #tpu.core_type<tc>, window_params = [{transform_indices = @transform_0, window_bounds = array<i64: 1, 1, 8, 8>}, {transform_indices = @transform_1, window_bounds = array<i64: 1, 8, 32>}, {pipeline_mode = #tpu.pipeline_mode<synchronous>, transform_indices = @transform_2, window_bounds = array<i64: 6, 48, 16>}, {pipeline_mode = #tpu.pipeline_mode<synchronous>, transform_indices = @transform_3, window_bounds = array<i64: 6, 1, 16>}, {pipeline_mode = #tpu.pipeline_mode<synchronous>, transform_indices = @transform_4, window_bounds = array<i64: 3, 32, 32>}, {pipeline_mode = #tpu.pipeline_mode<synchronous>, transform_indices = @transform_5, window_bounds = array<i64: 1, 32>}, {transform_indices = @transform_6, window_bounds = array<i64: 1, 8, 32>}]} {
    %c0_i32 = arith.constant 0 : i32
    %0 = arith.cmpi eq, %arg1, %c0_i32 : i32
    %1 = arith.extui %0 : i1 to i32
    %c0_i32_0 = arith.constant 0 : i32
    %2 = arith.cmpi ne, %1, %c0_i32_0 : i32
    scf.if %2 {
      %cst_47 = arith.constant 0.000000e+00 : f32
      %72 = vector.broadcast %cst_47 : f32 to vector<8x32xf32>
      %c0_48 = arith.constant 0 : index
      %c0_49 = arith.constant 0 : index
      %73 = vector.load %arg11[%c0_48, %c0_49] : memref<8x32xf32, #tpu.memory_space<vmem>>, vector<8x32xf32>
      tpu.vector_store %arg11[%c0_48, %c0_49], %72 {strides = array<i32>} : memref<8x32xf32, #tpu.memory_space<vmem>>, vector<8x32xf32>,
      %cst_50 = arith.constant 0.000000e+00 : f32
      %74 = vector.broadcast %cst_50 : f32 to vector<8x16xf32>
      %c0_51 = arith.constant 0 : index
      %c32_52 = arith.constant 32 : index
      %75 = vector.load %arg9[%c0_51, %c32_52] : memref<8x48xf32, #tpu.memory_space<vmem>>, vector<8x16xf32>
      tpu.vector_store %arg9[%c0_51, %c32_52], %74 {strides = array<i32>} : memref<8x48xf32, #tpu.memory_space<vmem>>, vector<8x16xf32>,
    } else {
    }
    %c0 = arith.constant 0 : index
    %c0_1 = arith.constant 0 : index
    %c0_2 = arith.constant 0 : index
    %c0_3 = arith.constant 0 : index
    %3 = vector.load %arg2[%c0, %c0_1, %c0_2, %c0_3] : memref<1x1x8x8xf32, #tpu.memory_space<vmem>>, vector<1x1x8x8xf32>
    %4 = vector.shape_cast %3 : vector<1x1x8x8xf32> to vector<1x8x8xf32>
    %c0_4 = arith.constant 0 : index
    %c0_5 = arith.constant 0 : index
    %c0_6 = arith.constant 0 : index
    %5 = vector.load %arg3[%c0_4, %c0_5, %c0_6] : memref<1x8x32xf32, #tpu.memory_space<vmem>>, vector<1x8x32xf32>
    %6 = vector.shape_cast %5 : vector<1x8x32xf32> to vector<8x32xf32>
    %cst = arith.constant dense<0.000000e+00> : vector<1x8xf32>
    %7 = vector.multi_reduction <add>, %4, %cst [2] : vector<1x8x8xf32> to vector<1x8xf32>
    %8 = vector.shape_cast %7 : vector<1x8xf32> to vector<1x8x1xf32>
    %cst_7 = arith.constant 1.000000e+00 : f32
    %9 = vector.broadcast %cst_7 : f32 to vector<1x8x1xf32>
    %10 = arith.addf %8, %9 : vector<1x8x1xf32>
    %11 = tpu.reciprocal %10 : vector<1x8x1xf32> -> vector<1x8x1xf32>
    %12 = vector.shape_cast %11 : vector<1x8x1xf32> to vector<8x1xf32>
    %13 = vector.shape_cast %12 : vector<8x1xf32> to vector<8x1xf32>
    %14 = vector.broadcast %13 : vector<8x1xf32> to vector<8x16xf32>
    "tpu.trace_start"() <{level = 10 : i32, message = "bnm,bmd->bnd"}> : () -> ()
    %cst_8 = arith.constant dense<0.000000e+00> : vector<1x8x32xf32>
    %15 = tpu.matmul %4, %5, %cst_8 {dimension_numbers = #tpu.dot_dimension_numbers<[2], [1], [1], [2], [0, 0, 0, 1, 1, 2], [0], [0]>} : vector<1x8x8xf32>, vector<1x8x32xf32>, vector<1x8x32xf32> -> vector<1x8x32xf32>
    "tpu.trace_stop"() : () -> ()
    %16 = vector.shape_cast %15 : vector<1x8x32xf32> to vector<8x32xf32>
    %17 = arith.addf %6, %16 : vector<8x32xf32>
    %c0_9 = arith.constant 0 : index
    %c0_10 = arith.constant 0 : index
    %18 = vector.load %arg9[%c0_9, %c0_10] : memref<8x48xf32, #tpu.memory_space<vmem>>, vector<8x32xf32>
    tpu.vector_store %arg9[%c0_9, %c0_10], %17 {strides = array<i32>} : memref<8x48xf32, #tpu.memory_space<vmem>>, vector<8x32xf32>,
    %c2_i32 = arith.constant 2 : i32
    %19 = arith.muli %arg1, %c2_i32 : i32
    %c0_i32_11 = arith.constant 0 : i32
    %20 = arith.addi %19, %c0_i32_11 : i32
    %21 = arith.index_cast %20 : i32 to index
    %c0_12 = arith.constant 0 : index
    %c0_13 = arith.constant 0 : index
    %22 = vector.load %arg4[%21, %c0_12, %c0_13] : memref<6x48x16xf32, #tpu.memory_space<vmem>>, vector<1x48x16xf32>
    %23 = vector.shape_cast %22 : vector<1x48x16xf32> to vector<48x16xf32>
    %24 = arith.index_cast %20 : i32 to index
    %c0_14 = arith.constant 0 : index
    %c0_15 = arith.constant 0 : index
    %25 = vector.load %arg5[%24, %c0_14, %c0_15] : memref<6x1x16xf32, #tpu.memory_space<vmem>>, vector<1x1x16xf32>
    %26 = vector.shape_cast %25 : vector<1x1x16xf32> to vector<1x16xf32>
    %cst_16 = arith.constant 2.000000e+00 : f32
    %27 = vector.broadcast %cst_16 : f32 to vector<1x16xf32>
    %28 = arith.mulf %27, %26 : vector<1x16xf32>
    %c0_17 = arith.constant 0 : index
    %c0_18 = arith.constant 0 : index
    %29 = vector.load %arg9[%c0_17, %c0_18] : memref<8x48xf32, #tpu.memory_space<vmem>>, vector<8x48xf32>
    %cst_19 = arith.constant dense<0.000000e+00> : vector<8x16xf32>
    %30 = tpu.matmul %29, %23, %cst_19 {dimension_numbers = #tpu.dot_dimension_numbers<[1], [0], [0], [1], [0, 0, 1, 1], [], []>} : vector<8x48xf32>, vector<48x16xf32>, vector<8x16xf32> -> vector<8x16xf32>
    %31 = vector.broadcast %28 : vector<1x16xf32> to vector<8x16xf32>
    %32 = arith.addf %30, %31 : vector<8x16xf32>
    %33 = arith.mulf %32, %14 : vector<8x16xf32>
    %cst_20 = arith.constant 0.000000e+00 : f32
    %34 = vector.broadcast %cst_20 : f32 to vector<8x16xf32>
    %35 = arith.maximumf %33, %34 : vector<8x16xf32>
    %c0_21 = arith.constant 0 : index
    %c0_22 = arith.constant 0 : index
    %36 = vector.load %arg10[%c0_21, %c0_22] : memref<8x32xf32, #tpu.memory_space<vmem>>, vector<8x16xf32>
    tpu.vector_store %arg10[%c0_21, %c0_22], %35 {strides = array<i32>} : memref<8x32xf32, #tpu.memory_space<vmem>>, vector<8x16xf32>,
    %37 = vector.shape_cast %35 : vector<8x16xf32> to vector<1x8x16xf32>
    "tpu.trace_start"() <{level = 10 : i32, message = "bnm,bmd->bnd"}> : () -> ()
    %cst_23 = arith.constant dense<0.000000e+00> : vector<1x8x16xf32>
    %38 = tpu.matmul %4, %37, %cst_23 {dimension_numbers = #tpu.dot_dimension_numbers<[2], [1], [1], [2], [0, 0, 0, 1, 1, 2], [0], [0]>} : vector<1x8x8xf32>, vector<1x8x16xf32>, vector<1x8x16xf32> -> vector<1x8x16xf32>
    "tpu.trace_stop"() : () -> ()
    %39 = vector.shape_cast %38 : vector<1x8x16xf32> to vector<8x16xf32>
    %40 = arith.addf %35, %39 : vector<8x16xf32>
    %c0_24 = arith.constant 0 : index
    %c32 = arith.constant 32 : index
    %41 = vector.load %arg9[%c0_24, %c32] : memref<8x48xf32, #tpu.memory_space<vmem>>, vector<8x16xf32>
    tpu.vector_store %arg9[%c0_24, %c32], %40 {strides = array<i32>} : memref<8x48xf32, #tpu.memory_space<vmem>>, vector<8x16xf32>,
    %c2_i32_25 = arith.constant 2 : i32
    %42 = arith.muli %arg1, %c2_i32_25 : i32
    %c1_i32 = arith.constant 1 : i32
    %43 = arith.addi %42, %c1_i32 : i32
    %44 = arith.index_cast %43 : i32 to index
    %c0_26 = arith.constant 0 : index
    %c0_27 = arith.constant 0 : index
    %45 = vector.load %arg4[%44, %c0_26, %c0_27] : memref<6x48x16xf32, #tpu.memory_space<vmem>>, vector<1x48x16xf32>
    %46 = vector.shape_cast %45 : vector<1x48x16xf32> to vector<48x16xf32>
    %47 = arith.index_cast %43 : i32 to index
    %c0_28 = arith.constant 0 : index
    %c0_29 = arith.constant 0 : index
    %48 = vector.load %arg5[%47, %c0_28, %c0_29] : memref<6x1x16xf32, #tpu.memory_space<vmem>>, vector<1x1x16xf32>
    %49 = vector.shape_cast %48 : vector<1x1x16xf32> to vector<1x16xf32>
    %cst_30 = arith.constant 2.000000e+00 : f32
    %50 = vector.broadcast %cst_30 : f32 to vector<1x16xf32>
    %51 = arith.mulf %50, %49 : vector<1x16xf32>
    %c0_31 = arith.constant 0 : index
    %c0_32 = arith.constant 0 : index
    %52 = vector.load %arg9[%c0_31, %c0_32] : memref<8x48xf32, #tpu.memory_space<vmem>>, vector<8x48xf32>
    %cst_33 = arith.constant dense<0.000000e+00> : vector<8x16xf32>
    %53 = tpu.matmul %52, %46, %cst_33 {dimension_numbers = #tpu.dot_dimension_numbers<[1], [0], [0], [1], [0, 0, 1, 1], [], []>} : vector<8x48xf32>, vector<48x16xf32>, vector<8x16xf32> -> vector<8x16xf32>
    %54 = vector.broadcast %51 : vector<1x16xf32> to vector<8x16xf32>
    %55 = arith.addf %53, %54 : vector<8x16xf32>
    %56 = arith.mulf %55, %14 : vector<8x16xf32>
    %cst_34 = arith.constant 0.000000e+00 : f32
    %57 = vector.broadcast %cst_34 : f32 to vector<8x16xf32>
    %58 = arith.maximumf %56, %57 : vector<8x16xf32>
    %c0_35 = arith.constant 0 : index
    %c16 = arith.constant 16 : index
    %59 = vector.load %arg10[%c0_35, %c16] : memref<8x32xf32, #tpu.memory_space<vmem>>, vector<8x16xf32>
    tpu.vector_store %arg10[%c0_35, %c16], %58 {strides = array<i32>} : memref<8x32xf32, #tpu.memory_space<vmem>>, vector<8x16xf32>,
    %c0_36 = arith.constant 0 : index
    %c0_37 = arith.constant 0 : index
    %60 = vector.load %arg10[%c0_36, %c0_37] : memref<8x32xf32, #tpu.memory_space<vmem>>, vector<8x32xf32>
    %61 = arith.addf %60, %6 : vector<8x32xf32>
    %62 = arith.index_cast %arg1 : i32 to index
    %c0_38 = arith.constant 0 : index
    %c0_39 = arith.constant 0 : index
    %63 = vector.load %arg6[%62, %c0_38, %c0_39] : memref<3x32x32xf32, #tpu.memory_space<vmem>>, vector<1x32x32xf32>
    %64 = vector.shape_cast %63 : vector<1x32x32xf32> to vector<32x32xf32>
    %c0_40 = arith.constant 0 : index
    %c0_41 = arith.constant 0 : index
    %65 = vector.load %arg11[%c0_40, %c0_41] : memref<8x32xf32, #tpu.memory_space<vmem>>, vector<8x32xf32>
    %cst_42 = arith.constant dense<0.000000e+00> : vector<8x32xf32>
    %66 = tpu.matmul %61, %64, %cst_42 {dimension_numbers = #tpu.dot_dimension_numbers<[1], [0], [0], [1], [0, 0, 1, 1], [], []>} : vector<8x32xf32>, vector<32x32xf32>, vector<8x32xf32> -> vector<8x32xf32>
    %67 = arith.addf %65, %66 : vector<8x32xf32>
    %c0_43 = arith.constant 0 : index
    %c0_44 = arith.constant 0 : index
    %68 = vector.load %arg11[%c0_43, %c0_44] : memref<8x32xf32, #tpu.memory_space<vmem>>, vector<8x32xf32>
    tpu.vector_store %arg11[%c0_43, %c0_44], %67 {strides = array<i32>} : memref<8x32xf32, #tpu.memory_space<vmem>>, vector<8x32xf32>,
    %c2_i32_45 = arith.constant 2 : i32
    %69 = arith.cmpi eq, %arg1, %c2_i32_45 : i32
    %70 = arith.extui %69 : i1 to i32
    %c0_i32_46 = arith.constant 0 : i32
    %71 = arith.cmpi ne, %70, %c0_i32_46 : i32
    scf.if %71 {
      %c0_47 = arith.constant 0 : index
      %c0_48 = arith.constant 0 : index
      %72 = vector.load %arg11[%c0_47, %c0_48] : memref<8x32xf32, #tpu.memory_space<vmem>>, vector<8x32xf32>
      %c0_49 = arith.constant 0 : index
      %c0_50 = arith.constant 0 : index
      %73 = vector.load %arg7[%c0_49, %c0_50] : memref<1x32xf32, #tpu.memory_space<vmem>>, vector<1x32xf32>
      %74 = vector.broadcast %73 : vector<1x32xf32> to vector<8x32xf32>
      %75 = arith.addf %72, %74 : vector<8x32xf32>
      %76 = vector.shape_cast %75 : vector<8x32xf32> to vector<1x8x32xf32>
      %c0_51 = arith.constant 0 : index
      %c0_52 = arith.constant 0 : index
      %c0_53 = arith.constant 0 : index
      %77 = vector.load %arg8[%c0_51, %c0_52, %c0_53] : memref<1x8x32xf32, #tpu.memory_space<vmem>>, vector<1x8x32xf32>
      tpu.vector_store %arg8[%c0_51, %c0_52, %c0_53], %76 {strides = array<i32>} : memref<1x8x32xf32, #tpu.memory_space<vmem>>, vector<1x8x32xf32>,
    } else {
    }
    return
  }
  func.func @transform_0(%arg0: i32, %arg1: i32) -> (i32, i32, i32, i32) {
    %c0_i32 = arith.constant 0 : i32
    %c0_i32_0 = arith.constant 0 : i32
    %c0_i32_1 = arith.constant 0 : i32
    return %arg0, %arg1, %c0_i32, %c0_i32_0 : i32, i32, i32, i32
  }
  func.func @transform_1(%arg0: i32, %arg1: i32) -> (i32, i32, i32) {
    %c0_i32 = arith.constant 0 : i32
    %c0_i32_0 = arith.constant 0 : i32
    %c0_i32_1 = arith.constant 0 : i32
    return %arg0, %c0_i32, %c0_i32_0 : i32, i32, i32
  }
  func.func @transform_2(%arg0: i32, %arg1: i32) -> (i32, i32, i32) {
    %c0_i32 = arith.constant 0 : i32
    %c0_i32_0 = arith.constant 0 : i32
    %c0_i32_1 = arith.constant 0 : i32
    %c0_i32_2 = arith.constant 0 : i32
    return %c0_i32, %c0_i32_0, %c0_i32_1 : i32, i32, i32
  }
  func.func @transform_3(%arg0: i32, %arg1: i32) -> (i32, i32, i32) {
    %c0_i32 = arith.constant 0 : i32
    %c0_i32_0 = arith.constant 0 : i32
    %c0_i32_1 = arith.constant 0 : i32
    %c0_i32_2 = arith.constant 0 : i32
    return %c0_i32, %c0_i32_0, %c0_i32_1 : i32, i32, i32
  }
  func.func @transform_4(%arg0: i32, %arg1: i32) -> (i32, i32, i32) {
    %c0_i32 = arith.constant 0 : i32
    %c0_i32_0 = arith.constant 0 : i32
    %c0_i32_1 = arith.constant 0 : i32
    %c0_i32_2 = arith.constant 0 : i32
    return %c0_i32, %c0_i32_0, %c0_i32_1 : i32, i32, i32
  }
  func.func @transform_5(%arg0: i32, %arg1: i32) -> (i32, i32) {
    %c0_i32 = arith.constant 0 : i32
    %c0_i32_0 = arith.constant 0 : i32
    %c0_i32_1 = arith.constant 0 : i32
    return %c0_i32, %c0_i32_0 : i32, i32
  }
  func.func @transform_6(%arg0: i32, %arg1: i32) -> (i32, i32, i32) {
    %c0_i32 = arith.constant 0 : i32
    %c0_i32_0 = arith.constant 0 : i32
    %c0_i32_1 = arith.constant 0 : i32
    return %arg0, %c0_i32, %c0_i32_0 : i32, i32, i32
  }
}

</mosaic_0001>

<bundles_post_ra>
// kernel: tpu_custom_call.1
= control target key start
LH: loop header
LB: loop body
LE: loop exit
PB: predicated region body
PF: predicated region fallthrough
CT: control target
= control target key end

     0   :  { %11 = vsyncpa [#allocation6], 0  ;;  %s1051_s0 = inlined_call_operand.vmem [shape: f32[2,3,8,8], index: 0, kind: input, shape index: {}]   ;;  %s1052_s1 = inlined_call_operand.vmem [shape: f32[2,8,32], index: 1, kind: input, shape index: {}]   ;;  %s1053_s2 = inlined_call_operand.vmem [shape: f32[6,48,16], index: 2, kind: input, shape index: {}]   ;;  %s1054_s3 = inlined_call_operand.vmem [shape: f32[6,1,16], index: 3, kind: input, shape index: {}]   ;;  %s1055_s4 = inlined_call_operand.vmem [shape: f32[3,32,32], index: 4, kind: input, shape index: {}]   ;;  %s1056_s5 = inlined_call_operand.vmem [shape: f32[1,32], index: 5, kind: input, shape index: {}]   ;;  %s1057_s6 = inlined_call_operand.hbm [shape: f32[2,8,32], index: 6, kind: output, shape index: {}]  }
   0x1   :  { %13 = vsyncpa [#allocation6 + $0x1], 0  ;;  %s869_s21 = smov 0   ;;  %s871_s22 = smov 0  }
   0x2   :  { %s873_s23 = smov 0   ;;  %s875_s24 = smov 0  }
   0x3   :  { %s877_s25 = smov 0   ;;  %s879_s26 = smov 0  }
   0x4   :  { %s881_s27 = smov 0   ;;  %s883_s28 = smov 0  }
   0x5 LB: > { %1061 = sst [smem:[#allocation8_spill]] %s821_s26  ;;  %s625_s29 = sadd.s32 4294967295, %s829_s28   ;;  %s829_s28 = sphi %s883_s28, %s19_s28   ;;  %s825_s27 = sphi %s881_s27, %s1070_s27   ;;  %s821_s26 = sphi %s879_s26, %s1069_s26   ;;  %s817_s25 = sphi %s877_s25, %s1068_s25   ;;  %s813_s24 = sphi %s875_s24, %s1067_s24   ;;  %s809_s23 = sphi %s873_s23, %s1073_s23   ;;  %s805_s22 = sphi %s871_s22, %s1072_s22   ;;  %s801_s21 = sphi %s869_s21, %s1071_s21  }
   0x6   : > { %1062 = sst [smem:[#allocation9_spill]] %s825_s27  ;;  %s626_s30 = sadd.s32 4294967294, %s829_s28  }
   0x7   : > { %s28_s7 = sadd.s32 1, %s821_s26  ;;  %s31_s8 = sadd.s32 1, %s825_s27 }
   0x8   : > { %p29_p0 = scmp.ge.s32.totalorder %s28_s7, 3  ;;  %p186_p1 = scmp.ne.s32.totalorder %s809_s23, %s805_s22 }
   0x9   : > { %p187_p2 = scmp.eq.s32.totalorder %s625_s29, 5  ;;  %p192_p4 = scmp.ne.s32.totalorder %s805_s22, %s801_s21 }
   0xa   : > { %s1075_s7 = smov (%p29_p0, %s28_s7), 0  ;;  %s1077_s8 = smov (!%p29_p0, %s31_s8), %s825_s27 }
   0xb   : > { %1063 = sst [smem:[#allocation10_spill]] %s1075_s7  ;;  %p918_p3 = por %p187_p2, %p186_p1 }
   0xc   : > { %p33_p5 = scmp.ge.s32.totalorder %s1077_s8, 2  ;;  %p193_p6 = scmp.eq.s32.totalorder %s626_s30, 5 }
   0xd   : > { %p629_p7 = scmp.ge.s32.totalorder %s829_s28, 1  ;;  %p241_p8 = scmp.lt.s32.totalorder %s829_s28, 7 }
   0xe   : > { %s1079_s8 = smov (%p33_p5, %s1077_s8), 0  ;;  %p928_p9 = por %p193_p6, %p192_p4 }
   0xf   : > { %1065 = sst [smem:[#allocation11_spill]] %s1079_s8  ;;  %p242_p10 = pnand %p629_p7, %p241_p8 }
  0x10   : > { %s173_s11 = ssub.s32 %s825_s27, %s1079_s8  ;;  %s176_s12 = sadd.s32 1, %s809_s23 }
  0x11   : > { %p174_p11 = scmp.eq.s32.totalorder %s173_s11, 0  ;;  %245 = sbr.rel (%p242_p10) target bundleno = 978 (0x3d2), region = 44 }
  0x12   : > { %s275_s14 = sand.u32 (!%p242_p10), 1, %s805_s22   ;;  %p278_p12 = scmp.lt.s32.totalorder (!%p242_p10), %s817_s25, 1 }
  0x13   : > { %s936_s13 = scalar_select %p174_p11, %s809_s23, %s176_s12  }
  0x14   : > { %s942_s15 = sshll.u32 (!%p242_p10), %s275_s14, 3  ;;  %p280_p13 = scmp.lt.s32.totalorder (!%p242_p10), %s813_s24, 2 }
  0x15   : > { %s277_s26 = scalar_lea.vmem (!%p242_p10), [#allocation5], %s942_s15  ;;  %p633_p0 = scmp.ne.s32.totalorder (!%p242_p10), %s813_s24, 0 }
  0x16   : > { %s279_s16 = scalar_select %p278_p12, %s817_s25, 1 }
  0x17   : > { %s281_s17 = scalar_select %p280_p13, %s813_s24, 2 }
  0x18   : > { %s657_s18 = smul.u32 3, %s279_s16  ;;  %s632_s19 = sshll.u32 %s279_s16, 3 }
  0x19   : > { %s289_s30 = scalar_lea.vmem %s1052_s1, %s632_s19  ;;  %293 = sbr.rel (%p633_p0) target bundleno = 33 (0x21), region = 48 }
  0x1a   : > { %s283_s11 = sadd.s32 %s657_s18, %s281_s17 }
  0x1b   : > { %s631_s12 = sshll.u32 %s283_s11, 3 }
  0x1c   : > { %s285_s27 = scalar_lea.vmem %s1051_s0, %s631_s12 }
  0x1e   : > { %vm294_vm0 = vcmask 261120   ;;  %vm296_vm1 = vcmask 392448   ;;  %v831_v0 = vmov 0.0  }
  0x1f   : > { %295 = vst.msk [vmem:[#allocation4] sm:$0xff] %vm294_vm0, %v831_v0 }
  0x20   : > { %297 = vst.msk [vmem:[#allocation2] sm:$0xff] %vm296_vm1, %v831_v0 }
  0x21 PF: > { %v955_v1 = vld [vmem:[%s289_s30] sm:$0xff]  ;;  %vm300_vm2 = vcmask 64512   ;;  %s636_s7 = smul.u32 96, %s813_s24  ;;  %vm343_vm3 = vcmask 261120   ;;  %vm361_vm4 = vcmask 392192   ;;  %vm387_vm9 = vcmask 130048  }
  0x22   : > { %v298_v2 = vld [vmem:[%s285_s27] sm:$0xff]  ;;  %337 = vmatpush.msra.mxu0 %v955_v1  ;;  %s635_s27 = sshll.u32 %s813_s24, 1  ;;  %s832_s29 = smov 32   ;;  %vm414_vm10 = vcmask 392448   ;;  %vm461_vm11 = vcmask 261248  }
  0x23   : > { %v301_v3 = vsel %vm300_vm2, %v298_v2, 0.0  ;;  %634 = vmatmul.msk.f32.vlgmr.msra.gmra.mxu0 %vm300_vm2, %v298_v2  ;;  %s964_s17 = scalar_lea.vmem %s1053_s2, %s636_s7  ;;  %s979_s20 = scalar_lea.vmem %s1054_s3, %s635_s27 }
  0x24   : > { %302 = vadd.xlane.f32.xlu0 %v301_v3  ;;  %v353_v4 = vld [vmem:[%s964_s17 + $0x28] sm:$0xff]  ;;  %v352_v5 = vld [vmem:[%s964_s17 + $0x20] sm:$0xff]  ;;  %v351_v6 = vld [vmem:[%s964_s17 + $0x18] sm:$0xff]  ;;  %s833_s30 = smov 16   ;;  %s650_s11 = sshll.u32 %s813_s24, 5 }
  0x25   : > { %375 = vmatpush.msra.mxu1 %v353_v4  ;;  %v350_v7 = vld [vmem:[%s964_s17 + $0x10] sm:$0xff]  ;;  %v349_v8 = vld [vmem:[%s964_s17 + $0x8] sm:$0xff]  ;;  %v348_v9 = vld [vmem:[%s964_s17] sm:$0xff]  ;;  %s466_s8 = scalar_lea.vmem %s1055_s4, %s650_s11  ;;  %p652_p1 = scmp.ne.s32.totalorder %s813_s24, 2 }
  0x26   : > { %v355_v18 = vld [vmem:[%s979_s20] sm:$0x1]  ;;  %v646_v32 = vld [vmem:[%s964_s17 + $0x58] sm:$0xff]  ;;  %v645_v33 = vld [vmem:[%s964_s17 + $0x50] sm:$0xff] }
  0x27   : > { %376 = vmatpush.msra.mxu1 %v352_v5  ;;  %v356_v20 = vmul.f32 2.0, %v355_v18  ;;  %445 = vmatpush.msra.mxu3 %v646_v32  ;;  %v644_v36 = vld [vmem:[%s964_s17 + $0x48] sm:$0xff]  ;;  %v643_v37 = vld [vmem:[%s964_s17 + $0x40] sm:$0xff]  ;;  %v642_v38 = vld [vmem:[%s964_s17 + $0x38] sm:$0xff] }
  0x28   : > { %v641_v39 = vld [vmem:[%s964_s17 + $0x30] sm:$0xff]  ;;  %v648_v42 = vld [vmem:[%s979_s20 + $0x1] sm:$0x1]  ;;  %v470_v49 = vld [vmem:[%s466_s8 + $0x18] sm:$0xff] }
  0x29   : > { %377 = vmatpush.msra.mxu1 %v351_v6  ;;  %v359_v24 = vperm.slane %v356_v20, 0  ;;  %446 = vmatpush.msra.mxu3 %v645_v33  ;;  %v427_v43 = vmul.f32 2.0, %v648_v42  ;;  %v469_v50 = vld [vmem:[%s466_s8 + $0x10] sm:$0xff]  ;;  %v468_v51 = vld [vmem:[%s466_s8 + $0x8] sm:$0xff]  ;;  %v467_v52 = vld [vmem:[%s466_s8] sm:$0xff] }
  0x2a   : > { %487 = vmatpush.msrb.mxu0 %v470_v49  ;;  %v471_v56 = vld [vmem:[#allocation4] sm:$0xff] }
  0x2b   : > { %378 = vmatpush.msra.mxu1 %v350_v7  ;;  %447 = vmatpush.msra.mxu3 %v644_v36  ;;  %v430_v44 = vperm.slane %v427_v43, 0 }
  0x2c   : > { %488 = vmatpush.msrb.mxu0 %v469_v50 }
  0x2d   : > { %379 = vmatpush.msra.mxu1 %v349_v8  ;;  %448 = vmatpush.msra.mxu3 %v643_v37 }
  0x2e   : > { %489 = vmatpush.msrb.mxu0 %v468_v51 }
  0x2f   : > { %380 = vmatpush.msra.mxu1 %v348_v9  ;;  %449 = vmatpush.msra.mxu3 %v642_v38 }
  0x30   : > { %490 = vmatpush.msrb.mxu0 %v467_v52 }
  0x31   : > { %450 = vmatpush.msra.mxu3 %v641_v39 }
  0x97   : > { %v303_v13 = vpop.xlane.xlu0 %302 }
  0x98   : > { %v304_v14 = vadd.f32 1.0, %v303_v13 }
  0x9a   : > { %732 = vrcp.f32 %v304_v14  ;;  %vm310_vm5 = vweird.f32 %v304_v14  ;;  %v316_v21 = vand.u32 2147483648, %v304_v14  ;;  %v314_v23 = vand.u32 2147483647, %v304_v14 }
  0x9c   : > { %v317_v25 = vor.u32 1.1754944e-38, %v316_v21  ;;  %vm315_vm8 = vcmp.eq.f32.partialorder %v314_v23, 8.507059e+37 }
  0xa0   : > { %v339_v10 = vpop.f32.mrf.mxu0  ;;  %v733_v15 = vpop.eup %732 }
  0xa1   : > { %v342_v11 = vadd.f32 %v339_v10, %v955_v1  ;;  %v306_v16 = vmul.f32 %v733_v15, %v304_v14  ;;  %vm311_vm6 = vweird.f32 %v733_v15 }
  0xa2   : > { %vm312_vm7 = vmor %vm310_vm5, %vm311_vm6 }
  0xa3   : > { %344 = vst.msk [vmem:[#allocation2] sm:$0xff] %vm343_vm3, %v342_v11  ;;  %v307_v17 = vsub.f32 1.0, %v306_v16 }
  0xa5   : > { %v308_v19 = vmul.f32 %v733_v15, %v307_v17 }
  0xa7   : > { %v309_v22 = vadd.f32 %v733_v15, %v308_v19 }
  0xa9   : > { %v313_v26 = vsel %vm312_vm7, %v733_v15, %v309_v22 }
  0xaa   : > { %v357_v12 = vld [vmem:[#allocation2] sm:$0xff]  ;;  %v318_v29 = vsel %vm315_vm8, %v317_v25, %v313_v26 }
  0xab   : > { %637 = vmatmul.msk.f32.vlgmr.msra.gmra.mxu1 %vm361_vm4, %v357_v12 }
 0x128   : > { %v382_v27 = vpop.f32.mrf.mxu1 }
 0x129   : > { %v383_v28 = vadd.f32 %v382_v27, %v359_v24 }
 0x12b   : > { %v385_v30 = vmul.f32 %v383_v28, %v318_v29 }
 0x12d   : > { %v386_v31 = vmax.f32 %v385_v30, 0.0 }
 0x12f   : > { %404 = vmatpush.msra.mxu2 %v386_v31  ;;  %388 = vst.msk [vmem:[#allocation3] sm:$0xff] %vm387_vm9, %v386_v31 }
 0x130   : > { %638 = vmatmul.msk.f32.vlgmr.msra.gmra.mxu2 %vm300_vm2, %v298_v2 }
 0x1b3   : > { %v406_v34 = vpop.f32.mrf.mxu2 }
 0x1b4   : > { %v409_v35 = vadd.f32 %v406_v34, %v386_v31 }
 0x1b6   : > { %411 = vrot.lane.b32.xlu0 %v409_v35, %s832_s29 }
 0x228   : > { %v412_v40 = vpop.permute.xlu0 %411 }
 0x229   : > { %415 = vst.msk [vmem:[#allocation2] sm:$0xff] %vm414_vm10, %v412_v40 }
 0x230   : > { %v428_v41 = vld [vmem:[#allocation2] sm:$0xff] }
 0x231   : > { %649 = vmatmul.msk.f32.vlgmr.msra.gmra.mxu3 %vm361_vm4, %v428_v41 }
 0x2b4   : > { %v452_v45 = vpop.f32.mrf.mxu3 }
 0x2b5   : > { %v453_v46 = vadd.f32 %v452_v45, %v430_v44 }
 0x2b7   : > { %v455_v47 = vmul.f32 %v453_v46, %v318_v29 }
 0x2b9   : > { %v456_v48 = vmax.f32 %v455_v47, 0.0 }
 0x2bb   : > { %458 = vrot.lane.b32.xlu1 %v456_v48, %s833_s30 }
 0x32d   : > { %v459_v53 = vpop.permute.xlu1 %458 }
 0x32e   : > { %462 = vst.msk [vmem:[#allocation3] sm:$0xff] %vm461_vm11, %v459_v53 }
 0x335   : > { %v463_v54 = vld [vmem:[#allocation3] sm:$0xff] }
 0x336   : > { %v464_v55 = vadd.f32 %v463_v54, %v955_v1 }
 0x338   : > { %651 = vmatmul.msk.f32.vlgmr.msrb.gmra.mxu0 %vm343_vm3, %v464_v55 }
 0x3b4   : > { %500 = sbr.rel (%p652_p1) target bundleno = 963 (0x3c3), region = 52 }
 0x3b5   : > { %v492_v57 = vpop.f32.mrf.mxu0 }
 0x3b6   : > { %v495_v58 = vadd.f32 %v492_v57, %v471_v56 }
 0x3b8   : > { %496 = vst.msk [vmem:[#allocation4] sm:$0xff] %vm343_vm3, %v495_v58 }
 0x3b9   : > { %v734_v60 = vld [vmem:[%s1056_s5] ss:$0 sm:$0xff] }
 0x3bf   : > { %v501_v59 = vld [vmem:[#allocation4] sm:$0xff] }
 0x3c0   : > { %v506_v61 = vadd.f32 %v734_v60, %v501_v59 }
 0x3c2   : > { %507 = vst.msk [vmem:[%s277_s26] sm:$0xff] %vm343_vm3, %v506_v61 }
 0x3c3 PF: > { %s654_s27 = sshll.u32 %s817_s25, 3  ;;  %s521_s20 = sshll.u32 %s277_s26, 4  ;;  %s522_s20 = int_to_ptr.vmem [resolvable:$true] %s521_s20 }
 0x3c4   : > { %s519_s24 = scalar_lea.hbm %s1057_s6, %s654_s27  ;;  %s509_s30 = scalar_lea.sflag [#allocation6], %s275_s14 }
 0x3c5   : > { %s523_s29 = sshll.u32 %s519_s24, 4  ;;  %s755_s8 = scalar_lea.hbm %s1057_s6, 16  ;;  %s524_s29 = int_to_ptr.hbm [resolvable:$true] %s523_s29 }
 0x3c6   : > { %s749_s11 = sshra.s32 %s524_s29, 4  ;;  %s750_s11 = int_to_ptr.hbm [resolvable:$true] %s749_s11 }
 0x3c7   : > { %s751_s12 = scalar_lea.hbm %s750_s11, 8  ;;  %p756_p6 = scmp.lt.s32.totalorder %s750_s11, %s1057_s6 }
 0x3c8   : > { %p752_p2 = scmp.ne.s32.totalorder %s750_s11, %s751_s12  ;;  %p757_p7 = scmp.lt.s32.totalorder %s755_s8, %s751_s12 }
 0x3ca   : > { %p753_p4 = pnand %p752_p2, %p918_p3  ;;  %p758_p8 = por %p757_p7, %p756_p6 }
 0x3cc   : > { %p754_p5 = pneg %p753_p4 }
 0x3ce   : > { %p759_p10 = pnand %p758_p8, %p754_p5 }
 0x3d0   : > { %762 = shalt.err (!%p759_p10)
}
 0x3d1   : > { %658 = dma.vmem_to_hbm [thread:$0]  (%p918_p3), %s522_s20, 128, %s524_s29, %s509_s30  }
 0x3d2 PF: > { %p664_p11 = scmp.ge.s32.totalorder %s829_s28, 2  ;;  %s535_s26 = sand.u32 1, %s801_s21  }
 0x3d3   : > { %s536_s14 = scalar_lea.sflag [#allocation6], %s535_s26 }
 0x3d4   : > { %p661_p12 = pnand %p664_p11, %p928_p9 }
 0x3d6   : > { %p662_p13 = pneg %p661_p12 }
 0x3d8   : > { %796 = dma.done.wait (%p662_p13), %s536_s14, 128  }
 0x3d9   : > { %798 = vsyncadd (%p662_p13), %s536_s14, 4294967168  ;;  %s19_s28 = sadd.s32 1, %s829_s28   ;;  %s1067_s24 = sld [smem:[#allocation8_spill]] }
 0x3da   : > { %p16_p0 = scmp.ge.s32.totalorder %s19_s28, 8   ;;  %s1068_s25 = sld [smem:[#allocation9_spill]] }
 0x3db   : > { %s1069_s26 = sld [smem:[#allocation10_spill]]  ;;  %s1071_s21 = smov %s805_s22 }
 0x3dc   : > { %s1070_s27 = sld [smem:[#allocation11_spill]]  ;;  %s1072_s22 = smov %s809_s23 }
 0x3dd   : > { %s1073_s23 = smov %s936_s13  ;;  %18 = sbr.rel (!%p16_p0) target bundleno = 5 (0x5), region = 95 }
 0x3e2   :  { %542 = vsyncpa [#allocation6], 1 }
 0x3e3   :  { %544 = vsyncpa [#allocation6 + $0x1], 1 }

</bundles_post_ra>
